<compile_context>
chip_gen: v7x
topology: tpu7x:2x2x1
jax: 0.10.0
libtpu: 0.0.40
codegen_flags: <defaults>
</compile_context>

<pallas_src>
import functools
import math

import jax
import jax.numpy as jnp
import numpy as np
from jax import lax
from jax.experimental import pallas as pl
from jax.experimental.pallas import tpu as pltpu

EPS = 1e-5
LANE = 128
M_TILE_TARGET = 512                 # rows per grid step (multiple of 128)
VMEM_LIMIT = 32 * 1024 * 1024       # explicit scoped-VMEM cap (safe on v5e/v6e/v7x)


# ---------------- small helpers ----------------

def _rup(x, m):
    return (x + m - 1) // m * m


def _pad_axis(a, axis, target):
    pad = target - a.shape[axis]
    if pad <= 0:
        return a
    cfg = [(0, 0)] * a.ndim
    cfg[axis] = (0, pad)
    return jnp.pad(a, cfg)


def _choose_m_tile(m):
    tm = min(M_TILE_TARGET, _rup(m, LANE))
    return tm, _rup(m, tm)


def _compiler_params():
    return pltpu.CompilerParams(dimension_semantics=("parallel",),
                                vmem_limit_bytes=VMEM_LIMIT)


def _resident(shape):
    # full-array block, constant index_map -> stays VMEM-resident across the grid
    n = len(shape)
    return pl.BlockSpec(shape, lambda i: (0,) * n)


# ---------------- Pallas kernels ----------------

def matmul_stats_kernel(x_ref, w_ref, y_ref, s_ref, ss_ref):
    """y = x @ w (bf16 MXU, f32 acc) + per-tile per-channel sum / sum-sq epilogue."""
    y = jnp.dot(x_ref[...], w_ref[...], preferred_element_type=jnp.float32)
    y_ref[...] = y
    c = y.shape[-1]
    s_ref[0] = jnp.broadcast_to(jnp.sum(y, axis=0, keepdims=True), (8, c))
    ss_ref[0] = jnp.broadcast_to(jnp.sum(y * y, axis=0, keepdims=True), (8, c))


def bn_relu_gconv3x3_stats_kernel(ysp_ref, scale_ref, shift_ref, mask_ref, w_ref,
                                  y2_ref, s_ref, ss_ref, *, H, W):
    """Per-image fused stage 2:
       h = relu(BN1(y1)) with the conv's zero spatial border restored by a
       resident 0/1 border mask, then the grouped 3x3 conv as 9 statically
       shifted matmuls against the densified block-diagonal tap weights
       (f32 accumulation), plus BN2 per-image partial statistics."""
    c = w_ref.shape[-1]
    y = ysp_ref[0]                                            # (H+2, W+2, C) f32
    h = jnp.maximum(y * scale_ref[...] + shift_ref[...], 0.0) * mask_ref[...]
    acc = jnp.zeros((H * W, c), jnp.float32)
    for kh in range(3):
        for kw in range(3):
            tap = h[kh:kh + H, kw:kw + W, :].reshape(H * W, c)
            acc = acc + jnp.dot(tap.astype(jnp.bfloat16), w_ref[kh * 3 + kw],
                                preferred_element_type=jnp.float32)
    y2_ref[0] = acc.reshape(H, W, c)
    s_ref[0] = jnp.broadcast_to(jnp.sum(acc, axis=0, keepdims=True), (8, c))
    ss_ref[0] = jnp.broadcast_to(jnp.sum(acc * acc, axis=0, keepdims=True), (8, c))


def bn_relu_matmul_stats_kernel(y_ref, scale_ref, shift_ref, w_ref,
                                o_ref, s_ref, ss_ref, *, m_valid, tm):
    """h = relu(BN(y)) fused with the next 1x1-conv matmul; padded rows masked so
    the downstream BN statistics stay clean."""
    h = jnp.maximum(y_ref[...] * scale_ref[...] + shift_ref[...], 0.0)
    row = lax.broadcasted_iota(jnp.int32, (tm, 1), 0) + pl.program_id(0) * tm
    h = jnp.where(row < m_valid, h, 0.0)
    o = jnp.dot(h.astype(jnp.bfloat16), w_ref[...],
                preferred_element_type=jnp.float32)
    o_ref[...] = o
    c = o.shape[-1]
    s_ref[0] = jnp.broadcast_to(jnp.sum(o, axis=0, keepdims=True), (8, c))
    ss_ref[0] = jnp.broadcast_to(jnp.sum(o * o, axis=0, keepdims=True), (8, c))


def bn_add_relu_kernel(y_ref, scale_ref, shift_ref, res_ref, o_ref):
    """out = relu(BN(y) + residual)."""
    o_ref[...] = jnp.maximum(
        y_ref[...] * scale_ref[...] + shift_ref[...] + res_ref[...], 0.0)


# ---------------- pallas_call wrappers ----------------

def _matmul_stats(x, w, *, tm):
    m_pad, k = x.shape
    c = w.shape[1]
    g = m_pad // tm
    return pl.pallas_call(
        matmul_stats_kernel,
        grid=(g,),
        in_specs=[pl.BlockSpec((tm, k), lambda i: (i, 0)),
                  _resident((k, c))],
        out_specs=[pl.BlockSpec((tm, c), lambda i: (i, 0)),
                   pl.BlockSpec((1, 8, c), lambda i: (i, 0, 0)),
                   pl.BlockSpec((1, 8, c), lambda i: (i, 0, 0))],
        out_shape=[jax.ShapeDtypeStruct((m_pad, c), jnp.float32),
                   jax.ShapeDtypeStruct((g, 8, c), jnp.float32),
                   jax.ShapeDtypeStruct((g, 8, c), jnp.float32)],
        compiler_params=_compiler_params(),
    )(x, w)


def _bn_relu_gconv3x3_stats(y1_2d, scale1, shift1, w2, *, N, H, W, wp):
    """Stage 2: per-image fused BN1+ReLU + grouped 3x3 conv + BN2 partial stats."""
    y1_sp = jnp.pad(y1_2d.reshape(N, H, W, wp), ((0, 0), (1, 1), (1, 1), (0, 0)))
    border = jnp.pad(jnp.ones((H, W, wp), jnp.float32), ((1, 1), (1, 1), (0, 0)))
    kern = functools.partial(bn_relu_gconv3x3_stats_kernel, H=H, W=W)
    return pl.pallas_call(
        kern,
        grid=(N,),
        in_specs=[pl.BlockSpec((1, H + 2, W + 2, wp), lambda n: (n, 0, 0, 0)),
                  _resident((1, wp)), _resident((1, wp)),
                  _resident((H + 2, W + 2, wp)),
                  _resident((9, wp, wp))],
        out_specs=[pl.BlockSpec((1, H, W, wp), lambda n: (n, 0, 0, 0)),
                   pl.BlockSpec((1, 8, wp), lambda n: (n, 0, 0)),
                   pl.BlockSpec((1, 8, wp), lambda n: (n, 0, 0))],
        out_shape=[jax.ShapeDtypeStruct((N, H, W, wp), jnp.float32),
                   jax.ShapeDtypeStruct((N, 8, wp), jnp.float32),
                   jax.ShapeDtypeStruct((N, 8, wp), jnp.float32)],
        compiler_params=_compiler_params(),
    )(y1_sp, scale1, shift1, border, w2)


def _bn_relu_matmul_stats(y, scale, shift, w, *, tm, m_valid):
    m_pad, c_in = y.shape
    c = w.shape[1]
    g = m_pad // tm
    kern = functools.partial(bn_relu_matmul_stats_kernel, m_valid=m_valid, tm=tm)
    return pl.pallas_call(
        kern,
        grid=(g,),
        in_specs=[pl.BlockSpec((tm, c_in), lambda i: (i, 0)),
                  _resident((1, c_in)), _resident((1, c_in)),
                  _resident((c_in, c))],
        out_specs=[pl.BlockSpec((tm, c), lambda i: (i, 0)),
                   pl.BlockSpec((1, 8, c), lambda i: (i, 0, 0)),
                   pl.BlockSpec((1, 8, c), lambda i: (i, 0, 0))],
        out_shape=[jax.ShapeDtypeStruct((m_pad, c), jnp.float32),
                   jax.ShapeDtypeStruct((g, 8, c), jnp.float32),
                   jax.ShapeDtypeStruct((g, 8, c), jnp.float32)],
        compiler_params=_compiler_params(),
    )(y, scale, shift, w)


def _bn_add_relu(y, scale, shift, res, *, tm):
    m_pad, c = y.shape
    g = m_pad // tm
    return pl.pallas_call(
        bn_add_relu_kernel,
        grid=(g,),
        in_specs=[pl.BlockSpec((tm, c), lambda i: (i, 0)),
                  _resident((1, c)), _resident((1, c)),
                  pl.BlockSpec((tm, c), lambda i: (i, 0))],
        out_specs=pl.BlockSpec((tm, c), lambda i: (i, 0)),
        out_shape=jax.ShapeDtypeStruct((m_pad, c), jnp.float32),
        compiler_params=_compiler_params(),
    )(y, scale, shift, res)


def _bn_scale_shift(s_parts, ss_parts, count, gamma, beta):
    """Finalize two-pass training-mode BN: per-channel scale/shift from partials."""
    s = jnp.sum(s_parts[:, 0, :], axis=0)
    ss = jnp.sum(ss_parts[:, 0, :], axis=0)
    mean = s / count
    var = jnp.maximum(ss / count - mean * mean, 0.0)   # E[y^2] - mean^2
    scale = gamma * lax.rsqrt(var + EPS)
    shift = beta - mean * scale
    return scale.reshape(1, -1), shift.reshape(1, -1)


# ---------------- Parameter init (deterministic, synthetic) ----------------

def _prepare_kernel_params(p):
    """Hoisted, jnp-only (trace-safe) kernel-layout weights: transposed, channel-
    padded to a multiple of 128 (lane-dense), grouped conv densified, bf16."""
    width, out_ch, groups = p["width"], p["out_ch"], p["groups"]
    inplanes = p["inplanes"]
    wp, cin_p, cout_p = _rup(width, LANE), _rup(inplanes, LANE), _rup(out_ch, LANE)
    in_pg = width // groups          # == out channels per group for conv2

    w1 = _pad_axis(_pad_axis(p["w1"][:, :, 0, 0].T, 0, cin_p), 1, wp)
    w3 = _pad_axis(_pad_axis(p["w3"][:, :, 0, 0].T, 0, wp), 1, cout_p)

    # grouped 3x3 -> block-diagonal dense, per-tap layout (9, Wp, Wp)
    # TODO(synk): at production widths (>128) this wastes `groups`x MXU FLOPs and
    # VMEM; replace with a per-group batched contraction there.
    w2 = jnp.transpose(p["w2"], (2, 3, 1, 0))                  # (3,3,in_pg,width)
    tgt = (jnp.arange(width) // in_pg)[None, :] * in_pg + jnp.arange(in_pg)[:, None]
    sel = jax.nn.one_hot(tgt, width, dtype=jnp.float32)        # (in_pg,width,width_in)
    dense = jnp.einsum("hwlc,lci->hwic", w2, sel)              # (3,3,width_in,width)
    dense = _pad_axis(_pad_axis(dense, 2, wp), 3, wp).reshape(9, wp, wp)

    return dict(
        w1k=w1.astype(jnp.bfloat16),
        w2k=dense.astype(jnp.bfloat16),
        w3k=w3.astype(jnp.bfloat16),
        g1p=_pad_axis(p["g1"], 0, wp), b1p=_pad_axis(p["b1"], 0, wp),
        g2p=_pad_axis(p["g2"], 0, wp), b2p=_pad_axis(p["b2"], 0, wp),
        g3p=_pad_axis(p["g3"], 0, cout_p), b3p=_pad_axis(p["b3"], 0, cout_p),
        Wp=wp, Cin_p=cin_p, Cout_p=cout_p,
    )


def init_params(key, inplanes, planes, groups=32, base_width=4):
    width = int(math.floor(planes * (base_width / 64.0)) * groups)
    out_ch = planes * 4  # expansion = 4
    ks = jax.random.split(key, 9)
    s = 0.05

    def q(a):  # keep conv weights bf16-representable so the f32 reference and the
        return a.astype(jnp.bfloat16).astype(jnp.float32)  # bf16 MXU path agree

    p = dict(
        w1=q(s * jax.random.normal(ks[0], (width, inplanes, 1, 1), jnp.float32)),
        w2=q(s * jax.random.normal(ks[1], (width, width // groups, 3, 3), jnp.float32)),
        w3=q(s * jax.random.normal(ks[2], (out_ch, width, 1, 1), jnp.float32)),
        g1=1.0 + 0.1 * jax.random.normal(ks[3], (width,), jnp.float32),
        b1=0.1 * jax.random.normal(ks[4], (width,), jnp.float32),
        g2=1.0 + 0.1 * jax.random.normal(ks[5], (width,), jnp.float32),
        b2=0.1 * jax.random.normal(ks[6], (width,), jnp.float32),
        g3=1.0 + 0.1 * jax.random.normal(ks[7], (out_ch,), jnp.float32),
        b3=0.1 * jax.random.normal(ks[8], (out_ch,), jnp.float32),
        groups=groups, width=width, out_ch=out_ch, inplanes=inplanes,
    )
    p["kernel"] = _prepare_kernel_params(p)
    return p


# ---------------- Forward (wrapper = layout glue only) ----------------

def resnext_bottleneck_forward(x_nchw, p, stride=1):
    # TODO(synk): stride>1 / downsample (projection residual) branch not implemented.
    assert stride == 1, "only the identity-residual configuration is supported"
    kp = p["kernel"]
    wp, cin_p = kp["Wp"], kp["Cin_p"]
    N, Cin, H, W = x_nchw.shape
    out_ch = p["out_ch"]
    assert Cin == out_ch, "identity residual requires inplanes == planes*4"

    M = N * H * W
    tm, m_pad = _choose_m_tile(M)

    x_nhwc = jnp.transpose(x_nchw, (0, 2, 3, 1)).astype(jnp.float32)
    x2d = _pad_axis(_pad_axis(x_nhwc.reshape(M, Cin), 1, cin_p), 0, m_pad)  # f32 residual
    x_bf16 = x2d.astype(jnp.bfloat16)                                       # matmul input

    # ---- stage 1: conv1 (1x1) as tiled matmul + BN1 partial stats ----
    y1, s1, ss1 = _matmul_stats(x_bf16, kp["w1k"], tm=tm)
    scale1, shift1 = _bn_scale_shift(s1, ss1, M, kp["g1p"], kp["b1p"])

    # ---- stage 2: fused BN1+ReLU + grouped 3x3 (pad=1) + BN2 partial stats ----
    # Per-image kernel reads the padded conv1 output once (no im2col HBM blowup).
    y2, s2, ss2 = _bn_relu_gconv3x3_stats(y1[:M], scale1, shift1, kp["w2k"],
                                          N=N, H=H, W=W, wp=wp)
    scale2, shift2 = _bn_scale_shift(s2, ss2, M, kp["g2p"], kp["b2p"])

    # ---- stage 3: fused BN2+ReLU + conv3 (1x1) matmul + BN3 partial stats ----
    y2_2d = _pad_axis(y2.reshape(M, wp), 0, m_pad)
    y3, s3, ss3 = _bn_relu_matmul_stats(y2_2d, scale2, shift2, kp["w3k"],
                                        tm=tm, m_valid=M)
    scale3, shift3 = _bn_scale_shift(s3, ss3, M, kp["g3p"], kp["b3p"])

    # ---- stage 4: BN3 + residual add + ReLU ----
    out2d = _bn_add_relu(y3, scale3, shift3, x2d, tm=tm)

    out = out2d[:M, :out_ch].reshape(N, H, W, out_ch)
    return jnp.transpose(out, (0, 3, 1, 2))  # back to NCHW


# ---------------- Pure-JAX reference (correctness check) ----------------

def reference_forward(x, p, stride=1):
    dn = ("NCHW", "OIHW", "NCHW")

    def bn(y, g, b):  # training-mode BN over (N, H, W)
        mean = jnp.mean(y, axis=(0, 2, 3), keepdims=True)
        var = jnp.mean((y - mean) ** 2, axis=(0, 2, 3), keepdims=True)
        return ((y - mean) / jnp.sqrt(var + EPS) * g.reshape(1, -1, 1, 1)
                + b.reshape(1, -1, 1, 1))

    out = lax.conv_general_dilated(x, p["w1"], (1, 1), "VALID", dimension_numbers=dn)
    out = jax.nn.relu(bn(out, p["g1"], p["b1"]))
    out = lax.conv_general_dilated(out, p["w2"], (stride, stride), ((1, 1), (1, 1)),
                                   dimension_numbers=dn,
                                   feature_group_count=p["groups"])
    out = jax.nn.relu(bn(out, p["g2"], p["b2"]))
    out = lax.conv_general_dilated(out, p["w3"], (1, 1), "VALID", dimension_numbers=dn)
    out = bn(out, p["g3"], p["b3"]) + x
    return jax.nn.relu(out)


if __name__ == "__main__":
    key = jax.random.PRNGKey(0)
    kx, kparam = jax.random.split(key)

    # Small ResNeXt bottleneck config: planes=32, groups=32, base_width=4
    #   -> width = 64, out channels = 128, identity residual (inplanes = 128)
    N, planes, groups, base_width = 2, 32, 32, 4
    inplanes = planes * 4
    H = W = 8

    x = jax.random.normal(kx, (N, inplanes, H, W), jnp.float32)
    x = x.astype(jnp.bfloat16).astype(jnp.float32)  # bf16-representable test input
    params = init_params(kparam, inplanes, planes, groups, base_width)

    out = resnext_bottleneck_forward(x, params, stride=1)
    out = jax.block_until_ready(out)

    ref = reference_forward(x, params, stride=1)
    if not np.allclose(np.asarray(out), np.asarray(ref), rtol=2e-2, atol=2e-2):
        err = float(jnp.max(jnp.abs(out - ref)))
        raise AssertionError(f"mismatch vs reference, max abs err {err}")
    print("KERNEL_OK")
</pallas_src>

<mosaic_0001>
module attributes {stable_mosaic.version = 11 : i64} {
  func.func @matmul_stats_kernel(%arg0: i32, %arg1: memref<128x128xbf16, #tpu.memory_space<vmem>>, %arg2: memref<128x128xbf16, #tpu.memory_space<vmem>>, %arg3: memref<128x128xf32, #tpu.memory_space<vmem>>, %arg4: memref<1x8x128xf32, #tpu.memory_space<vmem>>, %arg5: memref<1x8x128xf32, #tpu.memory_space<vmem>>) attributes {dimension_semantics = [#tpu.dimension_semantics<parallel>], iteration_bounds = array<i64: 1>, scalar_prefetch = 0 : i64, scratch_operands = 0 : i64, tpu.core_type = #tpu.core_type<tc>, window_params = [{transform_indices = @transform_0, window_bounds = array<i64: 128, 128>}, {pipeline_mode = #tpu.pipeline_mode<synchronous>, transform_indices = @transform_1, window_bounds = array<i64: 128, 128>}, {transform_indices = @transform_2, window_bounds = array<i64: 128, 128>}, {transform_indices = @transform_3, window_bounds = array<i64: 1, 8, 128>}, {transform_indices = @transform_4, window_bounds = array<i64: 1, 8, 128>}]} {
    %c0 = arith.constant 0 : index
    %c0_0 = arith.constant 0 : index
    %0 = vector.load %arg1[%c0, %c0_0] : memref<128x128xbf16, #tpu.memory_space<vmem>>, vector<128x128xbf16>
    %c0_1 = arith.constant 0 : index
    %c0_2 = arith.constant 0 : index
    %1 = vector.load %arg2[%c0_1, %c0_2] : memref<128x128xbf16, #tpu.memory_space<vmem>>, vector<128x128xbf16>
    %cst = arith.constant dense<0.000000e+00> : vector<128x128xf32>
    %2 = tpu.matmul %0, %1, %cst {dimension_numbers = #tpu.dot_dimension_numbers<[1], [0], [0], [1], [0, 0, 1, 1], [], []>} : vector<128x128xbf16>, vector<128x128xbf16>, vector<128x128xf32> -> vector<128x128xf32>
    %c0_3 = arith.constant 0 : index
    %c0_4 = arith.constant 0 : index
    %3 = vector.load %arg3[%c0_3, %c0_4] : memref<128x128xf32, #tpu.memory_space<vmem>>, vector<128x128xf32>
    tpu.vector_store %arg3[%c0_3, %c0_4], %2 {strides = array<i32>} : memref<128x128xf32, #tpu.memory_space<vmem>>, vector<128x128xf32>,
    %cst_5 = arith.constant dense<0.000000e+00> : vector<128xf32>
    %4 = vector.multi_reduction <add>, %2, %cst_5 [0] : vector<128x128xf32> to vector<128xf32>
    %5 = vector.shape_cast %4 : vector<128xf32> to vector<1x128xf32>
    %6 = vector.shape_cast %5 : vector<1x128xf32> to vector<1x128xf32>
    %7 = vector.broadcast %6 : vector<1x128xf32> to vector<8x128xf32>
    %c0_6 = arith.constant 0 : index
    %c0_7 = arith.constant 0 : index
    %c0_8 = arith.constant 0 : index
    %8 = vector.load %arg4[%c0_6, %c0_7, %c0_8] : memref<1x8x128xf32, #tpu.memory_space<vmem>>, vector<1x8x128xf32>
    %9 = vector.shape_cast %8 : vector<1x8x128xf32> to vector<8x128xf32>
    %10 = vector.shape_cast %7 : vector<8x128xf32> to vector<1x8x128xf32>
    tpu.vector_store %arg4[%c0_6, %c0_7, %c0_8], %10 {strides = array<i32>} : memref<1x8x128xf32, #tpu.memory_space<vmem>>, vector<1x8x128xf32>,
    %11 = arith.mulf %2, %2 : vector<128x128xf32>
    %cst_9 = arith.constant dense<0.000000e+00> : vector<128xf32>
    %12 = vector.multi_reduction <add>, %11, %cst_9 [0] : vector<128x128xf32> to vector<128xf32>
    %13 = vector.shape_cast %12 : vector<128xf32> to vector<1x128xf32>
    %14 = vector.shape_cast %13 : vector<1x128xf32> to vector<1x128xf32>
    %15 = vector.broadcast %14 : vector<1x128xf32> to vector<8x128xf32>
    %c0_10 = arith.constant 0 : index
    %c0_11 = arith.constant 0 : index
    %c0_12 = arith.constant 0 : index
    %16 = vector.load %arg5[%c0_10, %c0_11, %c0_12] : memref<1x8x128xf32, #tpu.memory_space<vmem>>, vector<1x8x128xf32>
    %17 = vector.shape_cast %16 : vector<1x8x128xf32> to vector<8x128xf32>
    %18 = vector.shape_cast %15 : vector<8x128xf32> to vector<1x8x128xf32>
    tpu.vector_store %arg5[%c0_10, %c0_11, %c0_12], %18 {strides = array<i32>} : memref<1x8x128xf32, #tpu.memory_space<vmem>>, vector<1x8x128xf32>,
    return
  }
  func.func @transform_0(%arg0: i32) -> (i32, i32) {
    %c0_i32 = arith.constant 0 : i32
    %c0_i32_0 = arith.constant 0 : i32
    return %arg0, %c0_i32 : i32, i32
  }
  func.func @transform_1(%arg0: i32) -> (i32, i32) {
    %c0_i32 = arith.constant 0 : i32
    %c0_i32_0 = arith.constant 0 : i32
    %c0_i32_1 = arith.constant 0 : i32
    return %c0_i32, %c0_i32_0 : i32, i32
  }
  func.func @transform_2(%arg0: i32) -> (i32, i32) {
    %c0_i32 = arith.constant 0 : i32
    %c0_i32_0 = arith.constant 0 : i32
    return %arg0, %c0_i32 : i32, i32
  }
  func.func @transform_3(%arg0: i32) -> (i32, i32, i32) {
    %c0_i32 = arith.constant 0 : i32
    %c0_i32_0 = arith.constant 0 : i32
    %c0_i32_1 = arith.constant 0 : i32
    return %arg0, %c0_i32, %c0_i32_0 : i32, i32, i32
  }
  func.func @transform_4(%arg0: i32) -> (i32, i32, i32) {
    %c0_i32 = arith.constant 0 : i32
    %c0_i32_0 = arith.constant 0 : i32
    %c0_i32_1 = arith.constant 0 : i32
    return %arg0, %c0_i32, %c0_i32_0 : i32, i32, i32
  }
}

</mosaic_0001>

<bundles_post_ra>
// kernel: tpu_custom_call.1
= control target key start
LH: loop header
LB: loop body
LE: loop exit
PB: predicated region body
PF: predicated region fallthrough
CT: control target
= control target key end

     0   :  { %10 = vsyncpa [#allocation3], 0  ;;  %s733_s0 = inlined_call_operand.hbm [shape: bf16[128,128], index: 0, kind: input, shape index: {}]   ;;  %s734_s1 = inlined_call_operand.hbm [shape: bf16[128,128], index: 1, kind: input, shape index: {}]   ;;  %s735_s2 = inlined_call_operand.hbm [shape: f32[128,128], index: 2, kind: output, shape index: {0}]   ;;  %s736_s3 = inlined_call_operand.hbm [shape: f32[1,8,128], index: 3, kind: output, shape index: {1}]   ;;  %s737_s4 = inlined_call_operand.hbm [shape: f32[1,8,128], index: 4, kind: output, shape index: {2}]  }
   0x1   :  { %11 = vsyncpa [#allocation6], 0 }
   0x2   :  { %12 = vsyncpa [#allocation4], 0 }
   0x3   :  { %13 = vsyncpa [#allocation9], 0  ;;  %s614_s15 = smov [#allocation2]   ;;  %s496_s19 = scalar_lea.hbm %s733_s0, 1024 }
   0x4   :  { %s19_s16 = sshll.u32 %s614_s15, 4  ;;  %p497_p0 = scmp.ne.s32.totalorder %s733_s0, %s496_s19  ;;  %s20_s16 = int_to_ptr.vmem [resolvable:$true] %s19_s16 }
   0x5   :  { %p500_p1 = scmp.lt.u32.totalorder %s496_s19, %s733_s0 }
   0x7   :  { %p502_p2 = pnand %p500_p1, %p497_p0 }
   0x9   :  { %505 = shalt.err (!%p502_p2)
}
   0xa   :  { %s506_s24 = scalar_lea.vmem %s20_s16, 1024  ;;  %p511_p4 = scmp.lt.s32.totalorder %s20_s16, %s20_s16 }
   0xb   :  { %p507_p3 = scmp.ne.s32.totalorder %s20_s16, %s506_s24  ;;  %p512_p5 = scmp.lt.s32.totalorder %s506_s24, %s506_s24 }
   0xd   :  { %p513_p6 = por %p512_p5, %p511_p4 }
   0xf   :  { %p514_p7 = pnand %p513_p6, %p507_p3 }
  0x11   :  { %517 = shalt.err (!%p514_p7)
}
  0x12   :  { %s615_s25 = smov 64   ;;  %s616_s26 = smov 4  }
  0x13   :  { %25 = dma.hbm_to_vmem [thread:$0]  %s733_s0, 1024, %s20_s16, [#allocation3], %s615_s25, %s615_s25, %s616_s26  }
  0x14   :  { %s617_s29 = smov [#allocation5]   ;;  %s518_s7 = scalar_lea.hbm %s734_s1, 1024 }
  0x15   :  { %s31_s30 = sshll.u32 %s617_s29, 4  ;;  %p519_p8 = scmp.ne.s32.totalorder %s734_s1, %s518_s7  ;;  %s32_s30 = int_to_ptr.vmem [resolvable:$true] %s31_s30 }
  0x16   :  { %p522_p9 = scmp.lt.u32.totalorder %s518_s7, %s734_s1 }
  0x18   :  { %p524_p10 = pnand %p522_p9, %p519_p8 }
  0x1a   :  { %527 = shalt.err (!%p524_p10)
}
  0x1b   :  { %s528_s12 = scalar_lea.vmem %s32_s30, 1024  ;;  %p533_p12 = scmp.lt.s32.totalorder %s32_s30, %s32_s30 }
  0x1c   :  { %p529_p11 = scmp.ne.s32.totalorder %s32_s30, %s528_s12  ;;  %p534_p13 = scmp.lt.s32.totalorder %s528_s12, %s528_s12 }
  0x1e   :  { %p535_p0 = por %p534_p13, %p533_p12 }
  0x20   :  { %p536_p1 = pnand %p535_p0, %p529_p11 }
  0x22   :  { %539 = shalt.err (!%p536_p1)
}
  0x23   :  { %37 = dma.hbm_to_vmem [thread:$0]  %s734_s1, 1024, %s32_s30, [#allocation6], %s615_s25, %s615_s25, %s616_s26  }
  0x24   :  { %606 = dma.done.wait [#allocation3], 1024  }
  0x25   :  { %607 = vsyncadd [#allocation3], 4294966272 }
  0x26   :  { %608 = dma.done.wait [#allocation6], 1024  }
  0x27   :  { %609 = vsyncadd [#allocation6], 4294966272  ;;  %v480_v0 = vld [vmem:[#allocation5] sm:$0xff]   ;;  %v481_v1 = vld [vmem:[#allocation5 + $0x8] sm:$0xff]   ;;  %s618_s1 = smov [#allocation7]  }
  0x28   :  { %423 = vmatprep.subr.bf16.mxu0 %v480_v0  ;;  %455 = vmatprep.subr.bf16.mxu1 %v480_v0  ;;  %v482_v2 = vld [vmem:[#allocation5 + $0x10] sm:$0xff]   ;;  %v483_v3 = vld [vmem:[#allocation5 + $0x18] sm:$0xff]   ;;  %v488_v4 = vld [vmem:[#allocation2] sm:$0xff]   ;;  %s351_s14 = sshll.u32 %s618_s1, 4  ;;  %s681_s14 = int_to_ptr.vmem [resolvable:$true] %s351_s14 }
  0x29   :  { %424 = vmatpush3.bf16.msra.mxu0 %v480_v0  ;;  %463 = vmatpush3.bf16.msra.mxu1 %v480_v0  ;;  %v484_v5 = vld [vmem:[#allocation5 + $0x20] sm:$0xff]   ;;  %v485_v7 = vld [vmem:[#allocation5 + $0x28] sm:$0xff]   ;;  %v486_v8 = vld [vmem:[#allocation5 + $0x30] sm:$0xff]   ;;  %s540_s15 = scalar_lea.vmem %s681_s14, 2048  ;;  %p545_p3 = scmp.lt.s32.totalorder %s681_s14, %s681_s14 }
  0x2a   :  { %425 = vmatprep.subr.bf16.mxu0 %v481_v1  ;;  %456 = vmatprep.subr.bf16.mxu1 %v481_v1  ;;  %v492_v6 = vld [vmem:[#allocation2 + $0x20] sm:$0xff]   ;;  %v487_v9 = vld [vmem:[#allocation5 + $0x38] sm:$0xff]   ;;  %v489_v10 = vld [vmem:[#allocation2 + $0x8] sm:$0xff]   ;;  %p541_p2 = scmp.ne.s32.totalorder %s681_s14, %s540_s15  ;;  %p546_p4 = scmp.lt.s32.totalorder %s540_s15, %s540_s15 }
  0x2b   :  { %439 = vmatprep.mubr.bf16.mxu0 %v488_v4  ;;  %447 = vmatprep.mubr.bf16.mxu1 %v492_v6  ;;  %v493_v11 = vld [vmem:[#allocation2 + $0x28] sm:$0xff]   ;;  %v490_v12 = vld [vmem:[#allocation2 + $0x10] sm:$0xff]   ;;  %v491_v14 = vld [vmem:[#allocation2 + $0x18] sm:$0xff]  }
  0x2c   :  { %v494_v13 = vld [vmem:[#allocation2 + $0x30] sm:$0xff]   ;;  %v495_v15 = vld [vmem:[#allocation2 + $0x38] sm:$0xff]   ;;  %p547_p5 = por %p546_p4, %p545_p3 }
  0x2d   :  { %426 = vmatpush3.bf16.msra.mxu0 %v481_v1  ;;  %464 = vmatpush3.bf16.msra.mxu1 %v481_v1 }
  0x2e   :  { %427 = vmatprep.subr.bf16.mxu0 %v482_v2  ;;  %457 = vmatprep.subr.bf16.mxu1 %v482_v2  ;;  %p548_p6 = pnand %p547_p5, %p541_p2 }
  0x31   :  { %428 = vmatpush3.bf16.msra.mxu0 %v482_v2  ;;  %465 = vmatpush3.bf16.msra.mxu1 %v482_v2 }
  0x32   :  { %429 = vmatprep.subr.bf16.mxu0 %v483_v3  ;;  %458 = vmatprep.subr.bf16.mxu1 %v483_v3 }
  0x35   :  { %430 = vmatpush3.bf16.msra.mxu0 %v483_v3  ;;  %466 = vmatpush3.bf16.msra.mxu1 %v483_v3 }
  0x36   :  { %431 = vmatprep.subr.bf16.mxu0 %v484_v5  ;;  %459 = vmatprep.subr.bf16.mxu1 %v484_v5 }
  0x39   :  { %432 = vmatpush3.bf16.msra.mxu0 %v484_v5  ;;  %467 = vmatpush3.bf16.msra.mxu1 %v484_v5 }
  0x3a   :  { %433 = vmatprep.subr.bf16.mxu0 %v485_v7  ;;  %460 = vmatprep.subr.bf16.mxu1 %v485_v7 }
  0x3d   :  { %434 = vmatpush3.bf16.msra.mxu0 %v485_v7  ;;  %468 = vmatpush3.bf16.msra.mxu1 %v485_v7 }
  0x3e   :  { %435 = vmatprep.subr.bf16.mxu0 %v486_v8  ;;  %461 = vmatprep.subr.bf16.mxu1 %v486_v8 }
  0x41   :  { %436 = vmatpush3.bf16.msra.mxu0 %v486_v8  ;;  %469 = vmatpush3.bf16.msra.mxu1 %v486_v8 }
  0x42   :  { %437 = vmatprep.subr.bf16.mxu0 %v487_v9  ;;  %462 = vmatprep.subr.bf16.mxu1 %v487_v9 }
  0x45   :  { %438 = vmatpush3.bf16.msra.mxu0 %v487_v9  ;;  %470 = vmatpush3.bf16.msra.mxu1 %v487_v9 }
  0x48   :  { %440 = vmatmul.mubr.bf16.vlgmr.msra.gmra.mrb[0].mxu0 %v489_v10  ;;  %448 = vmatmul.mubr.bf16.vlgmr.msra.gmra.mrb[0].mxu1 %v493_v11 }
  0x49   :  { %443 = vmatprep.mubr.bf16.mxu0 %v490_v12  ;;  %451 = vmatprep.mubr.bf16.mxu1 %v494_v13 }
  0x50   :  { %444 = vmatmul.mubr.bf16.gmra.mrb[4].mxu0 %v491_v14  ;;  %452 = vmatmul.mubr.bf16.gmra.mrb[4].mxu1 %v495_v15 }
 0x11b   :  { %v441_v16 = vpop.f32.mrb[0].mxu0  ;;  %v672_v17 = vpop.f32.mrb[0].mxu1 }
 0x11c   :  { %272 = vst [vmem:[#allocation7 + $0x10] sm:$0xff] %v441_v16  ;;  %v207_v18 = vpop.f32.mrb[1].mxu0  ;;  %280 = vst [vmem:[#allocation7 + $0x50] sm:$0xff] %v672_v17  ;;  %v675_v19 = vpop.f32.mrb[1].mxu1  ;;  %v310_v27 = vmul.f32 %v441_v16, %v441_v16 }
 0x11d   :  { %270 = vst [vmem:[#allocation7] sm:$0xff] %v207_v18  ;;  %v442_v20 = vpop.f32.mrb[2].mxu0  ;;  %278 = vst [vmem:[#allocation7 + $0x40] sm:$0xff] %v675_v19  ;;  %v678_v21 = vpop.f32.mrb[2].mxu1  ;;  %v308_v24 = vmul.f32 %v207_v18, %v207_v18 }
 0x11e   :  { %273 = vst [vmem:[#allocation7 + $0x18] sm:$0xff] %v442_v20  ;;  %v210_v22 = vpop.f32.mrb[3].mxu0  ;;  %281 = vst [vmem:[#allocation7 + $0x58] sm:$0xff] %v678_v21  ;;  %v242_v23 = vpop.f32.mrb[3].mxu1  ;;  %v311_v30 = vmul.f32 %v442_v20, %v442_v20 }
 0x11f   :  { %271 = vst [vmem:[#allocation7 + $0x8] sm:$0xff] %v210_v22  ;;  %v286_v25 = vadd.f32 %v210_v22, %v207_v18  ;;  %v309_v26 = vmul.f32 %v210_v22, %v210_v22  ;;  %279 = vst [vmem:[#allocation7 + $0x48] sm:$0xff] %v242_v23 }
 0x121   :  { %v287_v28 = vadd.f32 %v441_v16, %v286_v25  ;;  %v324_v29 = vadd.f32 %v309_v26, %v308_v24 }
 0x123   :  { %v325_v31 = vadd.f32 %v324_v29, %v310_v27  ;;  %v445_v32 = vpop.f32.mrb[4].mxu0  ;;  %v288_v33 = vadd.f32 %v442_v20, %v287_v28  ;;  %v453_v34 = vpop.f32.mrb[4].mxu1 }
 0x124   :  { %276 = vst [vmem:[#allocation7 + $0x30] sm:$0xff] %v445_v32  ;;  %v223_v35 = vpop.f32.mrb[5].mxu0  ;;  %284 = vst [vmem:[#allocation7 + $0x70] sm:$0xff] %v453_v34  ;;  %v255_v36 = vpop.f32.mrb[5].mxu1 }
 0x125   :  { %274 = vst [vmem:[#allocation7 + $0x20] sm:$0xff] %v223_v35  ;;  %v289_v37 = vadd.f32 %v288_v33, %v223_v35  ;;  %v312_v38 = vmul.f32 %v223_v35, %v223_v35  ;;  %v326_v39 = vadd.f32 %v325_v31, %v311_v30  ;;  %v446_v40 = vpop.f32.mrb[6].mxu0  ;;  %282 = vst [vmem:[#allocation7 + $0x60] sm:$0xff] %v255_v36  ;;  %v454_v41 = vpop.f32.mrb[6].mxu1 }
 0x126   :  { %277 = vst [vmem:[#allocation7 + $0x38] sm:$0xff] %v446_v40  ;;  %v226_v42 = vpop.f32.mrb[7].mxu0  ;;  %285 = vst [vmem:[#allocation7 + $0x78] sm:$0xff] %v454_v41  ;;  %v258_v43 = vpop.f32.mrb[7].mxu1 }
 0x127   :  { %v327_v44 = vadd.f32 %v326_v39, %v312_v38  ;;  %275 = vst [vmem:[#allocation7 + $0x28] sm:$0xff] %v226_v42  ;;  %v290_v45 = vadd.f32 %v289_v37, %v226_v42  ;;  %v313_v46 = vmul.f32 %v226_v42, %v226_v42  ;;  %283 = vst [vmem:[#allocation7 + $0x68] sm:$0xff] %v258_v43 }
 0x128   :  { %551 = shalt.err (!%p548_p6)
}
 0x129   :  { %s552_s18 = scalar_lea.hbm %s735_s2, 2048 }
 0x12a   :  { %p553_p7 = scmp.ne.s32.totalorder %s735_s2, %s552_s18  ;;  %p556_p8 = scmp.lt.u32.totalorder %s552_s18, %s735_s2 }
 0x12c   :  { %p558_p9 = pnand %p556_p8, %p553_p7 }
 0x12e   :  { %561 = shalt.err (!%p558_p9)
}
 0x12f   :  { %s619_s23 = smov 128   ;;  %s620_s24 = smov 8   ;;  %v314_v47 = vmul.f32 %v445_v32, %v445_v32  ;;  %v291_v48 = vadd.f32 %v445_v32, %v290_v45  ;;  %v328_v49 = vadd.f32 %v327_v44, %v313_v46  ;;  %v315_v50 = vmul.f32 %v446_v40, %v446_v40 }
 0x130   :  { %357 = dma.vmem_to_hbm [thread:$0]  %s681_s14, 2048, %s735_s2, [#allocation4], %s619_s23, %s619_s23, %s620_s24   ;;  %v316_v53 = vmul.f32 %v675_v19, %v675_v19  ;;  %v317_v58 = vmul.f32 %v242_v23, %v242_v23  ;;  %v318_v59 = vmul.f32 %v672_v17, %v672_v17  ;;  %v319_v62 = vmul.f32 %v678_v21, %v678_v21 }
 0x131   :  { %v329_v51 = vadd.f32 %v328_v49, %v314_v47  ;;  %v292_v52 = vadd.f32 %v446_v40, %v291_v48  ;;  %v320_v1 = vmul.f32 %v255_v36, %v255_v36  ;;  %v321_v6 = vmul.f32 %v258_v43, %v258_v43  ;;  %s621_s2 = smov [#allocation8]   ;;  %s622_s28 = smov [#allocation10]  }
 0x132   :  { %v322_v7 = vmul.f32 %v453_v34, %v453_v34  ;;  %v323_v10 = vmul.f32 %v454_v41, %v454_v41  ;;  %s364_s27 = sshll.u32 %s621_s2, 4  ;;  %s374_s29 = sshll.u32 %s622_s28, 4  ;;  %s365_s27 = int_to_ptr.vmem [resolvable:$true] %s364_s27  ;;  %s375_s29 = int_to_ptr.vmem [resolvable:$true] %s374_s29 }
 0x133   :  { %v293_v54 = vadd.f32 %v292_v52, %v675_v19  ;;  %v330_v55 = vadd.f32 %v329_v51, %v315_v50  ;;  %s562_s30 = scalar_lea.vmem %s365_s27, 128  ;;  %p567_p11 = scmp.lt.s32.totalorder %s365_s27, %s365_s27 }
 0x134   :  { %p563_p10 = scmp.ne.s32.totalorder %s365_s27, %s562_s30  ;;  %p568_p12 = scmp.lt.s32.totalorder %s562_s30, %s562_s30 }
 0x135   :  { %v331_v56 = vadd.f32 %v330_v55, %v316_v53  ;;  %v294_v57 = vadd.f32 %v293_v54, %v242_v23 }
 0x136   :  { %p569_p13 = por %p568_p12, %p567_p11 }
 0x137   :  { %v295_v60 = vadd.f32 %v672_v17, %v294_v57  ;;  %v332_v61 = vadd.f32 %v331_v56, %v317_v58 }
 0x138   :  { %p570_p0 = pnand %p569_p13, %p563_p10 }
 0x139   :  { %v333_v63 = vadd.f32 %v332_v61, %v318_v59  ;;  %v296_v0 = vadd.f32 %v678_v21, %v295_v60 }
 0x13b   :  { %v297_v2 = vadd.f32 %v296_v0, %v255_v36  ;;  %v334_v3 = vadd.f32 %v333_v63, %v319_v62 }
 0x13d   :  { %v335_v4 = vadd.f32 %v334_v3, %v320_v1  ;;  %v298_v5 = vadd.f32 %v297_v2, %v258_v43 }
 0x13f   :  { %v299_v8 = vadd.f32 %v453_v34, %v298_v5  ;;  %v336_v9 = vadd.f32 %v335_v4, %v321_v6 }
 0x141   :  { %v300_v11 = vadd.f32 %v454_v41, %v299_v8  ;;  %v337_v12 = vadd.f32 %v336_v9, %v322_v7 }
 0x143   :  { %v301_v13 = vrot.slane %v300_v11, 4  ;;  %v338_v14 = vadd.f32 %v337_v12, %v323_v10 }
 0x145   :  { %v339_v15 = vrot.slane %v338_v14, 4  ;;  %v302_v16 = vadd.f32 %v301_v13, %v300_v11 }
 0x147   :  { %v303_v17 = vrot.slane %v302_v16, 2  ;;  %v340_v18 = vadd.f32 %v339_v15, %v338_v14 }
 0x149   :  { %v304_v19 = vadd.f32 %v303_v17, %v302_v16  ;;  %v341_v20 = vrot.slane %v340_v18, 2 }
 0x14b   :  { %v305_v21 = vrot.slane %v304_v19, 1  ;;  %v342_v22 = vadd.f32 %v341_v20, %v340_v18 }
 0x14d   :  { %v306_v23 = vadd.f32 %v305_v21, %v304_v19  ;;  %v343_v24 = vrot.slane %v342_v22, 1 }
 0x14f   :  { %307 = vst [vmem:[#allocation8] sm:$0xff] %v306_v23  ;;  %v344_v25 = vadd.f32 %v343_v24, %v342_v22 }
 0x150   :  { %573 = shalt.err (!%p570_p0)
}
 0x151   :  { %s574_s7 = scalar_lea.hbm %s736_s3, 128 }
 0x152   :  { %p575_p1 = scmp.ne.s32.totalorder %s736_s3, %s574_s7  ;;  %p578_p2 = scmp.lt.u32.totalorder %s574_s7, %s736_s3 }
 0x154   :  { %p580_p3 = pnand %p578_p2, %p575_p1 }
 0x156   :  { %583 = shalt.err (!%p580_p3)
}
 0x157   :  { %367 = dma.vmem_to_hbm [thread:$0]  %s365_s27, 128, %s736_s3, [#allocation9]   ;;  %345 = vst [vmem:[#allocation10] sm:$0xff] %v344_v25 }
 0x158   :  { %s584_s13 = scalar_lea.vmem %s375_s29, 128  ;;  %p589_p5 = scmp.lt.s32.totalorder %s375_s29, %s375_s29 }
 0x159   :  { %p585_p4 = scmp.ne.s32.totalorder %s375_s29, %s584_s13  ;;  %p590_p6 = scmp.lt.s32.totalorder %s584_s13, %s584_s13 }
 0x15b   :  { %p591_p7 = por %p590_p6, %p589_p5 }
 0x15d   :  { %p592_p8 = pnand %p591_p7, %p585_p4 }
 0x15f   :  { %595 = shalt.err (!%p592_p8)
}
 0x160   :  { %s596_s15 = scalar_lea.hbm %s737_s4, 128 }
 0x161   :  { %p597_p9 = scmp.ne.s32.totalorder %s737_s4, %s596_s15  ;;  %p600_p10 = scmp.lt.u32.totalorder %s596_s15, %s737_s4 }
 0x163   :  { %p602_p11 = pnand %p600_p10, %p597_p9 }
 0x165   :  { %605 = shalt.err (!%p602_p11)
}
 0x166   :  { %377 = dma.vmem_to_hbm [thread:$0]  %s375_s29, 128, %s737_s4, [#allocation9]  }
 0x167   :  { %610 = dma.done.wait [#allocation4], 2048  }
 0x168   :  { %611 = vsyncadd [#allocation4], 4294965248 }
 0x169   :  { %612 = dma.done.wait [#allocation9], 256  }
 0x16a   :  { %613 = vsyncadd [#allocation9], 4294967040 }
 0x16b   :  { %387 = vsyncpa [#allocation3], 1 }
 0x16c   :  { %388 = vsyncpa [#allocation6], 1 }
 0x16d   :  { %389 = vsyncpa [#allocation4], 1 }
 0x16e   :  { %390 = vsyncpa [#allocation9], 1 }

</bundles_post_ra>
